<compile_context>
chip_gen: v5e
topology: v5e:2x2
jax: 0.10.0
libtpu: 0.0.40
codegen_flags: <defaults>
</compile_context>

<pallas_src>
import jax
import jax.numpy as jnp
from jax.experimental import pallas as pl
from jax.experimental.pallas import tpu as pltpu


def _round_up(n: int, m: int) -> int:
    return ((n + m - 1) // m) * m


def _pad2d(a, rows: int, cols: int):
    pr, pc = rows - a.shape[0], cols - a.shape[1]
    if pr or pc:
        a = jnp.pad(a, ((0, pr), (0, pc)))
    return a


def _vmem_limit_bytes() -> int:
    """~75% of physical VMEM (48 MiB on v7x, 96 MiB on v5e/v6e)."""
    cap = 64 * 1024 * 1024
    try:
        info = pltpu.get_tpu_info()
        cap = int(getattr(info, "vmem_capacity_bytes", cap))
    except Exception:
        pass
    return (cap * 3) // 4


def _vmem_estimate(tm: int, tf: int, dm_p: int) -> int:
    """Rough per-step VMEM need (double-buffered inputs/outputs)."""
    return (2 * tm * dm_p * 2            # x tile, bf16, 2 buffers
            + 2 * 2 * dm_p * tf * 2      # W1 + W2 tiles, bf16, 2 buffers
            + 2 * (tf + dm_p) * 4        # biases, f32, 2 buffers
            + 2 * tm * dm_p * 4)         # output tile, f32, 2 buffers


def ffn_kernel(x_ref, w1_ref, b1_ref, w2_ref, b2_ref, o_ref):
    # Grid: (i over M row tiles [parallel], k over d_ff tiles [arbitrary]).
    # o_ref's block index is (i, 0) for every k, so it is the accumulator.
    k = pl.program_id(1)

    # First matmul in bf16 -> f32, bias add in f32, fused downcast so the
    # (tm, tf) intermediate flows to the second matmul as bf16.
    h = (jnp.dot(x_ref[...], w1_ref[...], preferred_element_type=jnp.float32)
         + b1_ref[...]).astype(jnp.bfloat16)

    # Dropout(p) in eval mode == identity.

    # Second matmul: partial product over this d_ff tile.
    p = jnp.dot(h, w2_ref[...], preferred_element_type=jnp.float32)

    @pl.when(k == 0)
    def _():
        o_ref[...] = p + b2_ref[...]      # no zero-init / read-modify-write

    @pl.when(k != 0)
    def _():
        o_ref[...] += p


def feed_forward(x, w1, b1, w2, b2, *, tm=256, tf=512, training=False):
    """x: [batch, seq, d_model] -> [batch, seq, d_model].

    w1: (d_model, d_ff), b1: (d_ff,), w2: (d_ff, d_model), b2: (d_model,).
    (Weights are stored pre-transposed relative to nn.Linear.weight.)
    """
    if training:
        # TODO(synk): training-mode dropout not implemented in the kernel.
        raise NotImplementedError("feed_forward kernel is inference-only")

    batch, seq, d_model = x.shape
    d_ff = w1.shape[1]
    M = batch * seq
    out_dtype = x.dtype

    vmem_limit = _vmem_limit_bytes()
    vmem_budget = (vmem_limit * 7) // 10   # headroom for compiler scratch

    # Lane-dense padding of d_model (256-aligned for fuller MXU passes when
    # the model is big enough for it to matter).
    dm_align = 256 if d_model > 128 else 128
    dm_p = _round_up(d_model, dm_align)

    # Row tile: 8-aligned, clamped to the (padded) problem size.
    tm = _round_up(max(tm, 8), 8)
    tm_eff = min(tm, _round_up(M, 8))
    # Megacore: make sure the "parallel" M axis has >= 2 steps for small M.
    if _round_up(M, tm_eff) // tm_eff < 2 and M > 8:
        tm_eff = _round_up(-(-M // 2), 8)
    m_p = _round_up(M, tm_eff)
    grid_m = m_p // tm_eff

    # d_ff tiling: keep the whole (padded) d_ff resident in VMEM when it fits
    # the budget (weights then DMA'd once for the whole grid); otherwise tile
    # it and reduce over k.
    dff_full = _round_up(d_ff, 128)
    if _vmem_estimate(tm_eff, dff_full, dm_p) <= vmem_budget:
        tf_eff = dff_full                      # weights VMEM-resident
    else:
        tf = _round_up(max(tf, 128), 128)
        tf_eff = min(tf, dff_full)
        while tf_eff > 128 and _vmem_estimate(tm_eff, tf_eff, dm_p) > vmem_budget:
            tf_eff -= 128
    dff_p = _round_up(d_ff, tf_eff)
    grid_k = dff_p // tf_eff

    # Single cast + single pad per operand (no f32 round-trip in the wrapper).
    x2d = x.reshape(M, d_model)
    if x2d.dtype != jnp.bfloat16:
        x2d = x2d.astype(jnp.bfloat16)
    x2d = _pad2d(x2d, m_p, dm_p)
    w1p = _pad2d(w1.astype(jnp.bfloat16), dm_p, dff_p)
    w2p = _pad2d(w2.astype(jnp.bfloat16), dff_p, dm_p)
    b1p = _pad2d(b1.reshape(1, d_ff).astype(jnp.float32), 1, dff_p)
    b2p = _pad2d(b2.reshape(1, d_model).astype(jnp.float32), 1, dm_p)

    grid = (grid_m, grid_k)

    flops = 4 * m_p * dm_p * dff_p  # two (M, dm, dff) matmuls
    w_streams = 1 if grid_k == 1 else grid_m   # weights re-streamed per i tile
    bytes_accessed = (x2d.size * 2
                      + (w1p.size + w2p.size) * 2 * w_streams
                      + (b1p.size + b2p.size) * 4
                      + m_p * dm_p * 4)

    # NOTE: biases could use pipeline_mode=pl.Buffered(1) to drop their second
    # (tiny) VMEM buffer; left at defaults for compiler compatibility.  Do NOT
    # single-buffer W1/W2 when grid_k > 1 (would expose the weight DMA).
    out2d = pl.pallas_call(
        ffn_kernel,
        out_shape=jax.ShapeDtypeStruct((m_p, dm_p), jnp.float32),
        grid_spec=pltpu.PrefetchScalarGridSpec(
            num_scalar_prefetch=0,
            grid=grid,
            in_specs=[
                pl.BlockSpec((tm_eff, dm_p), lambda i, k: (i, 0)),   # x rows
                pl.BlockSpec((dm_p, tf_eff), lambda i, k: (0, k)),   # W1 tile
                pl.BlockSpec((1, tf_eff), lambda i, k: (0, k)),      # b1 tile
                pl.BlockSpec((tf_eff, dm_p), lambda i, k: (k, 0)),   # W2 tile
                pl.BlockSpec((1, dm_p), lambda i, k: (0, 0)),        # b2
            ],
            out_specs=pl.BlockSpec((tm_eff, dm_p), lambda i, k: (i, 0)),
        ),
        compiler_params=pltpu.CompilerParams(
            dimension_semantics=("parallel", "arbitrary"),
            vmem_limit_bytes=vmem_limit,
        ),
        cost_estimate=pl.CostEstimate(
            flops=flops, transcendentals=0, bytes_accessed=bytes_accessed),
    )(x2d, w1p, b1p, w2p, b2p)

    return out2d[:M, :d_model].astype(out_dtype).reshape(batch, seq, d_model)


if __name__ == "__main__":
    # Small shapes consistent with the module's forward.
    batch, seq, d_model, d_ff = 2, 8, 32, 64
    dropout_p = 0.1  # unused at inference

    key = jax.random.PRNGKey(0)
    kx, kw1, kb1, kw2, kb2 = jax.random.split(key, 5)

    x = jax.random.normal(kx, (batch, seq, d_model), dtype=jnp.float32)

    # nn.Linear(d_model, d_ff): weight (d_ff, d_model), bias (d_ff,)
    # Stored pre-transposed for row-major x @ W.
    w1 = jax.random.normal(kw1, (d_model, d_ff), dtype=jnp.float32) * 0.05
    b1 = jax.random.normal(kb1, (d_ff,), dtype=jnp.float32) * 0.05
    # nn.Linear(d_ff, d_model): weight (d_model, d_ff), bias (d_model,)
    w2 = jax.random.normal(kw2, (d_ff, d_model), dtype=jnp.float32) * 0.05
    b2 = jax.random.normal(kb2, (d_model,), dtype=jnp.float32) * 0.05

    out = feed_forward(x, w1, b1, w2, b2)
    out = jax.block_until_ready(out)

    # Cross-check against plain f32 JAX reference (PyTorch eval semantics).
    # Tolerance loosened intentionally: MXU inputs (x, W1, W2, h) are bf16
    # with f32 accumulation, so results differ from the pure-f32 reference
    # at the ~1e-3 level.
    ref = (x.reshape(-1, d_model) @ w1 + b1) @ w2 + b2
    ref = ref.reshape(batch, seq, d_model)
    assert jnp.allclose(out, ref, atol=2e-2, rtol=2e-2), (
        float(jnp.max(jnp.abs(out - ref))))

    print("KERNEL_OK")
</pallas_src>

<mosaic_0001>
module attributes {stable_mosaic.version = 11 : i64} {
  func.func @ffn_kernel(%arg0: i32, %arg1: i32, %arg2: memref<8x128xbf16, #tpu.memory_space<vmem>>, %arg3: memref<128x128xbf16, #tpu.memory_space<vmem>>, %arg4: memref<1x128xf32, #tpu.memory_space<vmem>>, %arg5: memref<128x128xbf16, #tpu.memory_space<vmem>>, %arg6: memref<1x128xf32, #tpu.memory_space<vmem>>, %arg7: memref<8x128xf32, #tpu.memory_space<vmem>>) attributes {dimension_semantics = [#tpu.dimension_semantics<parallel>, #tpu.dimension_semantics<arbitrary>], iteration_bounds = array<i64: 2, 1>, scalar_prefetch = 0 : i64, scratch_operands = 0 : i64, tpu.core_type = #tpu.core_type<tc>, window_params = [{transform_indices = @transform_0, window_bounds = array<i64: 8, 128>}, {transform_indices = @transform_1, window_bounds = array<i64: 128, 128>}, {transform_indices = @transform_2, window_bounds = array<i64: 1, 128>}, {transform_indices = @transform_3, window_bounds = array<i64: 128, 128>}, {pipeline_mode = #tpu.pipeline_mode<synchronous>, transform_indices = @transform_4, window_bounds = array<i64: 1, 128>}, {transform_indices = @transform_5, window_bounds = array<i64: 8, 128>}]} {
    %c0 = arith.constant 0 : index
    %c0_0 = arith.constant 0 : index
    %0 = vector.load %arg2[%c0, %c0_0] : memref<8x128xbf16, #tpu.memory_space<vmem>>, vector<8x128xbf16>
    %c0_1 = arith.constant 0 : index
    %c0_2 = arith.constant 0 : index
    %1 = vector.load %arg3[%c0_1, %c0_2] : memref<128x128xbf16, #tpu.memory_space<vmem>>, vector<128x128xbf16>
    %cst = arith.constant dense<0.000000e+00> : vector<8x128xf32>
    %2 = tpu.matmul %0, %1, %cst {dimension_numbers = #tpu.dot_dimension_numbers<[1], [0], [0], [1], [0, 0, 1, 1], [], []>} : vector<8x128xbf16>, vector<128x128xbf16>, vector<8x128xf32> -> vector<8x128xf32>
    %c0_3 = arith.constant 0 : index
    %c0_4 = arith.constant 0 : index
    %3 = vector.load %arg4[%c0_3, %c0_4] : memref<1x128xf32, #tpu.memory_space<vmem>>, vector<1x128xf32>
    %4 = vector.broadcast %3 : vector<1x128xf32> to vector<8x128xf32>
    %5 = arith.addf %2, %4 : vector<8x128xf32>
    %6 = arith.truncf %5 : vector<8x128xf32> to vector<8x128xbf16>
    %c0_5 = arith.constant 0 : index
    %c0_6 = arith.constant 0 : index
    %7 = vector.load %arg5[%c0_5, %c0_6] : memref<128x128xbf16, #tpu.memory_space<vmem>>, vector<128x128xbf16>
    %cst_7 = arith.constant dense<0.000000e+00> : vector<8x128xf32>
    %8 = tpu.matmul %6, %7, %cst_7 {dimension_numbers = #tpu.dot_dimension_numbers<[1], [0], [0], [1], [0, 0, 1, 1], [], []>} : vector<8x128xbf16>, vector<128x128xbf16>, vector<8x128xf32> -> vector<8x128xf32>
    %c0_i32 = arith.constant 0 : i32
    %9 = arith.cmpi eq, %arg1, %c0_i32 : i32
    %10 = arith.extui %9 : i1 to i32
    %c0_i32_8 = arith.constant 0 : i32
    %11 = arith.cmpi ne, %10, %c0_i32_8 : i32
    scf.if %11 {
      %c0_11 = arith.constant 0 : index
      %c0_12 = arith.constant 0 : index
      %15 = vector.load %arg6[%c0_11, %c0_12] : memref<1x128xf32, #tpu.memory_space<vmem>>, vector<1x128xf32>
      %16 = vector.broadcast %15 : vector<1x128xf32> to vector<8x128xf32>
      %17 = arith.addf %8, %16 : vector<8x128xf32>
      %c0_13 = arith.constant 0 : index
      %c0_14 = arith.constant 0 : index
      %18 = vector.load %arg7[%c0_13, %c0_14] : memref<8x128xf32, #tpu.memory_space<vmem>>, vector<8x128xf32>
      tpu.vector_store %arg7[%c0_13, %c0_14], %17 {strides = array<i32>} : memref<8x128xf32, #tpu.memory_space<vmem>>, vector<8x128xf32>,
    } else {
    }
    %c0_i32_9 = arith.constant 0 : i32
    %12 = arith.cmpi ne, %arg1, %c0_i32_9 : i32
    %13 = arith.extui %12 : i1 to i32
    %c0_i32_10 = arith.constant 0 : i32
    %14 = arith.cmpi ne, %13, %c0_i32_10 : i32
    scf.if %14 {
      %c0_11 = arith.constant 0 : index
      %c0_12 = arith.constant 0 : index
      %15 = vector.load %arg7[%c0_11, %c0_12] : memref<8x128xf32, #tpu.memory_space<vmem>>, vector<8x128xf32>
      %16 = arith.addf %15, %8 : vector<8x128xf32>
      %c0_13 = arith.constant 0 : index
      %c0_14 = arith.constant 0 : index
      %17 = vector.load %arg7[%c0_13, %c0_14] : memref<8x128xf32, #tpu.memory_space<vmem>>, vector<8x128xf32>
      tpu.vector_store %arg7[%c0_13, %c0_14], %16 {strides = array<i32>} : memref<8x128xf32, #tpu.memory_space<vmem>>, vector<8x128xf32>,
    } else {
    }
    return
  }
  func.func @transform_0(%arg0: i32, %arg1: i32) -> (i32, i32) {
    %c0_i32 = arith.constant 0 : i32
    %c0_i32_0 = arith.constant 0 : i32
    return %arg0, %c0_i32 : i32, i32
  }
  func.func @transform_1(%arg0: i32, %arg1: i32) -> (i32, i32) {
    %c0_i32 = arith.constant 0 : i32
    %c0_i32_0 = arith.constant 0 : i32
    return %c0_i32, %arg1 : i32, i32
  }
  func.func @transform_2(%arg0: i32, %arg1: i32) -> (i32, i32) {
    %c0_i32 = arith.constant 0 : i32
    %c0_i32_0 = arith.constant 0 : i32
    return %c0_i32, %arg1 : i32, i32
  }
  func.func @transform_3(%arg0: i32, %arg1: i32) -> (i32, i32) {
    %c0_i32 = arith.constant 0 : i32
    %c0_i32_0 = arith.constant 0 : i32
    return %arg1, %c0_i32 : i32, i32
  }
  func.func @transform_4(%arg0: i32, %arg1: i32) -> (i32, i32) {
    %c0_i32 = arith.constant 0 : i32
    %c0_i32_0 = arith.constant 0 : i32
    %c0_i32_1 = arith.constant 0 : i32
    return %c0_i32, %c0_i32_0 : i32, i32
  }
  func.func @transform_5(%arg0: i32, %arg1: i32) -> (i32, i32) {
    %c0_i32 = arith.constant 0 : i32
    %c0_i32_0 = arith.constant 0 : i32
    return %arg0, %c0_i32 : i32, i32
  }
}

</mosaic_0001>

<bundles_post_ra>
// kernel: tpu_custom_call.1
= control target key start
LH: loop header
LB: loop body
LE: loop exit
PB: predicated region body
PF: predicated region fallthrough
CT: control target
= control target key end

     0   :  { %10 = vsyncpa [#allocation3], 0  ;;  %s1174_s0 = inlined_call_operand.hbm [shape: bf16[16,128], index: 0, kind: input, shape index: {}]   ;;  %s1175_s1 = inlined_call_operand.hbm [shape: bf16[128,128], index: 1, kind: input, shape index: {}]   ;;  %s1176_s2 = inlined_call_operand.vmem [shape: f32[1,128], index: 2, kind: input, shape index: {}]   ;;  %s1177_s3 = inlined_call_operand.hbm [shape: bf16[128,128], index: 3, kind: input, shape index: {}]   ;;  %s1178_s4 = inlined_call_operand.vmem [shape: f32[1,128], index: 4, kind: input, shape index: {}]   ;;  %s1179_s5 = inlined_call_operand.hbm [shape: f32[16,128], index: 5, kind: output, shape index: {}]  }
   0x1   :  { %12 = vsyncpa [#allocation3 + $0x1], 0 }
   0x2   :  { %13 = vsyncpa [#allocation6], 0 }
   0x3   :  { %14 = vsyncpa [#allocation4], 0 }
   0x4   :  { %16 = vsyncpa [#allocation4 + $0x1], 0  ;;  %s1020_s18 = smov 0   ;;  %s1022_s19 = smov 0  }
   0x5   :  { %s1024_s20 = smov 0   ;;  %s1026_s21 = smov 0  }
   0x6   :  { %s1028_s22 = smov 0   ;;  %s1030_s23 = smov 0  }
   0x7 LB: > { %s623_s24 = sadd.s32 4294967295, %s984_s23   ;;  %p625_p0 = scmp.ge.s32.totalorder %s984_s23, 1  ;;  %s984_s23 = sphi %s1030_s23, %s22_s23   ;;  %s980_s22 = sphi %s1028_s22, %s1189_s22   ;;  %s976_s21 = sphi %s1026_s21, %s1188_s21   ;;  %s972_s20 = sphi %s1024_s20, %s1187_s20   ;;  %s968_s19 = sphi %s1022_s19, %s1186_s19   ;;  %s964_s18 = sphi %s1020_s18, %s1185_s18  }
   0x8   : > { %p1054_p1 = scmp.eq.s32.totalorder %s623_s24, 0  ;;  %p190_p2 = scmp.lt.s32.totalorder %s984_s23, 3 }
   0x9   : > { %s203_s28 = sshll.u32 %s1175_s1, 4  ;;  %s986_s30 = smov [#allocation5]   ;;  %s204_s28 = int_to_ptr.hbm [resolvable:$true] %s203_s28 }
   0xa   : > { %p1062_p3 = pnand %p625_p0, %p190_p2  ;;  %s205_s6 = sshll.u32 %s986_s30, 4  ;;  %s206_s6 = int_to_ptr.vmem [resolvable:$true] %s205_s6 }
   0xb   : > { %p629_p6 = scmp.ge.s32.totalorder %s984_s23, 2  ;;  %s226_s9 = sshll.u32 %s1177_s3, 4  ;;  %s227_s9 = int_to_ptr.hbm [resolvable:$true] %s226_s9 }
   0xc   : > { %p733_p4 = pneg %p1062_p3  ;;  %s987_s10 = smov 64  }
   0xd   : > { %s988_s11 = smov 4   ;;  %s989_s12 = smov [#allocation7]  }
   0xe   : > { %p734_p5 = pnand %p733_p4, %p1054_p1  ;;  %s228_s13 = sshll.u32 %s989_s12, 4  ;;  %s229_s13 = int_to_ptr.vmem [resolvable:$true] %s228_s13 }
   0xf   : > { %s34_s14 = sadd.s32 1, %s980_s22  ;;  %s624_s15 = sadd.s32 4294967294, %s984_s23  }
  0x10   : > { %736 = dma.hbm_to_vmem [thread:$0]  (!%p734_p5), %s204_s28, 1024, %s206_s6, [#allocation6], %s987_s10, %s987_s10, %s988_s11  }
  0x11   : > { %739 = dma.hbm_to_vmem [thread:$0]  (!%p734_p5), %s227_s9, 1024, %s229_s13, [#allocation6], %s987_s10, %s987_s10, %s988_s11  }
  0x12   : > { %p36_p7 = scmp.ge.s32.totalorder %s34_s14, 2  ;;  %s41_s16 = sadd.s32 1, %s972_s20 }
  0x13   : > { %p48_p8 = scmp.ne.s32.totalorder %s972_s20, %s968_s19  ;;  %p49_p9 = scmp.eq.s32.totalorder %s984_s23, 0 }
  0x14   : > { %s1191_s14 = smov (%p36_p7, %s34_s14), 0  ;;  %p54_p10 = scmp.ne.s32.totalorder %s968_s19, %s964_s18 }
  0x15   : > { %s38_s17 = ssub.s32 %s980_s22, %s1191_s14  ;;  %p177_p11 = scmp.eq.s32.totalorder %s623_s24, 1 }
  0x16   : > { %p39_p12 = scmp.eq.s32.totalorder %s38_s17, 0  ;;  %p1090_p13 = por %p1054_p1, %p54_p10 }
  0x17   : > { %p1094_p0 = por %p177_p11, %p48_p8  ;;  %p183_p2 = scmp.eq.s32.totalorder %s624_s15, 1 }
  0x18   : > { %s1099_s28 = scalar_select %p39_p12, %s972_s20, %s41_s16  }
  0x19   : > { %p50_p4 = por %p49_p9, %p48_p8  ;;  %p1101_p5 = por %p183_p2, %p54_p10 }
  0x1a   : > { %s245_s6 = sand.u32 1, %s972_s20   ;;  %s631_s24 = sshll.u32 %s980_s22, 2 }
  0x1b   : > { %p750_p7 = scmp.lt.s32.totalorder %s984_s23, 2  ;;  %s630_s7 = sshll.u32 %s245_s6, 2 }
  0x1c   : > { %s253_s10 = scalar_lea.hbm %s1174_s0, %s631_s24  ;;  %s249_s12 = scalar_lea.vmem [#allocation2], %s630_s7 }
  0x1d   : > { %s255_s11 = sshll.u32 %s253_s10, 4  ;;  %s257_s13 = sshll.u32 %s249_s12, 4  ;;  %s256_s11 = int_to_ptr.hbm [resolvable:$true] %s255_s11  ;;  %s258_s13 = int_to_ptr.vmem [resolvable:$true] %s257_s13 }
  0x1e   : > { %p741_p11 = pnand %p750_p7, %p50_p4  ;;  %s246_s15 = scalar_lea.sflag [#allocation3], %s245_s6 }
  0x1f   : > { %266 = sbr.rel (%p1062_p3) target bundleno = 335 (0x14f), region = 40  ;;  %s1114_s16 = sand.u32 (!%p1062_p3), 1, %s968_s19  }
  0x20   : > { %743 = dma.hbm_to_vmem [thread:$0]  (!%p741_p11), %s256_s11, 64, %s258_s13, %s246_s15  }
  0x21   : > { %s633_s17 = sshll.u32 (!%p1062_p3), %s1114_s16, 2  ;;  %s269_s8 = scalar_lea.sflag (!%p1062_p3), [#allocation3], %s1114_s16 }
  0x22   : > { %s1118_s24 = scalar_lea.vmem (!%p1062_p3), [#allocation2], %s633_s17 }
  0x24   : > { %951 = dma.done.wait (%p1090_p13), %s269_s8, 64  }
  0x25   : > { %953 = vsyncadd (%p1090_p13), %s269_s8, 4294967232 }
  0x26   : > { %955 = dma.done.wait (%p1054_p1), [#allocation6], 2048  }
  0x27   : > { %957 = vsyncadd (%p1054_p1), [#allocation6], 4294965248  ;;  %v712_v0 = vld [vmem:[#allocation5 + $0x38] sm:$0xff]  ;;  %v711_v1 = vld [vmem:[#allocation5 + $0x30] sm:$0xff]  ;;  %s702_s26 = sshll.u32 %s976_s21, 3  ;;  %s636_s6 = sshll.u32 %s1114_s16, 3 }
  0x28   : > { %386 = vmatpush.bf16.msra.mxu0 %v712_v0  ;;  %v720_v2 = vld [vmem:[#allocation7 + $0x38] sm:$0xff]  ;;  %v719_v3 = vld [vmem:[#allocation7 + $0x30] sm:$0xff]  ;;  %v710_v4 = vld [vmem:[#allocation5 + $0x28] sm:$0xff]  ;;  %s505_s10 = scalar_lea.hbm %s1179_s5, %s702_s26  ;;  %s312_s13 = scalar_lea.vmem [#allocation8], %s636_s6 }
  0x29   : > { %464 = vmatpush.bf16.msra.mxu1 %v720_v2  ;;  %v718_v5 = vld [vmem:[#allocation7 + $0x28] sm:$0xff]  ;;  %v709_v6 = vld [vmem:[#allocation5 + $0x20] sm:$0xff]  ;;  %v708_v8 = vld [vmem:[#allocation5 + $0x18] sm:$0xff]  ;;  %s507_s15 = sshll.u32 %s312_s13, 4  ;;  %s509_s17 = sshll.u32 %s505_s10, 4  ;;  %s508_s15 = int_to_ptr.vmem [resolvable:$true] %s507_s15  ;;  %s510_s17 = int_to_ptr.hbm [resolvable:$true] %s509_s17 }
  0x2a   : > { %v717_v7 = vld [vmem:[#allocation7 + $0x20] sm:$0xff]  ;;  %v716_v9 = vld [vmem:[#allocation7 + $0x18] sm:$0xff]  ;;  %v707_v10 = vld [vmem:[#allocation5 + $0x10] sm:$0xff]  ;;  %s495_s8 = scalar_lea.sflag [#allocation4], %s1114_s16  ;;  %s912_s21 = sshra.s32 %s510_s17, 4  ;;  %s913_s21 = int_to_ptr.hbm [resolvable:$true] %s912_s21 }
  0x2b   : > { %v715_v11 = vld [vmem:[#allocation7 + $0x10] sm:$0xff]  ;;  %v706_v12 = vld [vmem:[#allocation5 + $0x8] sm:$0xff]  ;;  %v705_v14 = vld [vmem:[#allocation5] sm:$0xff]  ;;  %s918_s26 = scalar_lea.hbm %s1179_s5, 16  ;;  %p919_p9 = scmp.lt.s32.totalorder %s913_s21, %s1179_s5 }
  0x2c   : > { %387 = vmatpush.bf16.msra.mxu0 %v711_v1  ;;  %v714_v13 = vld [vmem:[#allocation7 + $0x8] sm:$0xff]  ;;  %v317_v15 = vld [vmem:[%s1118_s24] sm:$0xf]  ;;  %v713_v16 = vld [vmem:[#allocation7] sm:$0xff]  ;;  %s914_s24 = scalar_lea.hbm %s913_s21, 8 }
  0x2d   : > { %465 = vmatpush.bf16.msra.mxu1 %v719_v3  ;;  %v806_v17 = vld [vmem:[%s1176_s2] ss:$0 sm:$0xff]  ;;  %p915_p1 = scmp.ne.s32.totalorder %s913_s21, %s914_s24  ;;  %p920_p10 = scmp.lt.s32.totalorder %s918_s26, %s914_s24 }
  0x2e   : > { %v807_v22 = vld [vmem:[%s1178_s4] ss:$0 sm:$0xff] }
  0x2f   : > { %p916_p3 = pnand %p915_p1, %p1094_p0  ;;  %p921_p12 = por %p920_p10, %p919_p9 }
  0x30   : > { %388 = vmatpush.bf16.msra.mxu0 %v710_v4 }
  0x31   : > { %466 = vmatpush.bf16.msra.mxu1 %v718_v5  ;;  %p917_p8 = pneg %p916_p3 }
  0x33   : > { %p922_p13 = pnand %p921_p12, %p917_p8 }
  0x34   : > { %389 = vmatpush.bf16.msra.mxu0 %v709_v6 }
  0x35   : > { %467 = vmatpush.bf16.msra.mxu1 %v717_v7 }
  0x38   : > { %390 = vmatpush.bf16.msra.mxu0 %v708_v8 }
  0x39   : > { %468 = vmatpush.bf16.msra.mxu1 %v716_v9 }
  0x3c   : > { %391 = vmatpush.bf16.msra.mxu0 %v707_v10 }
  0x3d   : > { %469 = vmatpush.bf16.msra.mxu1 %v715_v11 }
  0x40   : > { %392 = vmatpush.bf16.msra.mxu0 %v706_v12 }
  0x41   : > { %470 = vmatpush.bf16.msra.mxu1 %v714_v13 }
  0x44   : > { %393 = vmatpush.bf16.msra.mxu0 %v705_v14 }
  0x45   : > { %471 = vmatpush.bf16.msra.mxu1 %v713_v16 }
  0x47   : > { %394 = vmatmul.bf16.vlgmr.msra.gmra.mxu0 %v317_v15 }
  0xc4   : > { %v395_v18 = vpop.f32.mrf.mxu0 }
  0xc5   : > { %v396_v19 = vadd.f32 %v806_v17, %v395_v18 }
  0xc7   : > { %v399_v20 = vpack.c.bf16 %v396_v19, %v396_v19 }
  0xc9   : > { %472 = vmatmul.bf16.vlgmr.msra.gmra.mxu1 %v399_v20 }
  0xcc   : > { %v397_v21 = vpop.f32.mrf.mxu0 }
 0x146   : > { %v473_v23 = vpop.f32.mrf.mxu1 }
 0x147   : > { %v485_v24 = vadd.f32 %v807_v22, %v473_v23 }
 0x149   : > { %486 = vst [vmem:[%s312_s13] sm:$0xff] %v485_v24 }
 0x14a   : > { %925 = shalt.err (!%p922_p13)
}
 0x14b   : > { %731 = dma.vmem_to_hbm [thread:$0]  (%p1094_p0), %s508_s15, 128, %s510_s17, %s495_s8  }
 0x14e   : > { %v475_v25 = vpop.f32.mrf.mxu1 }
 0x14f PF: > { %s521_s16 = sand.u32 1, %s964_s18   ;;  %p745_p2 = pnand %p629_p6, %p1101_p5 }
 0x150   : > { %s522_s9 = scalar_lea.sflag [#allocation4], %s521_s16 }
 0x151   : > { %p746_p4 = pneg %p745_p2 }
 0x153   : > { %959 = dma.done.wait (%p746_p4), %s522_s9, 128  }
 0x154   : > { %961 = vsyncadd (%p746_p4), %s522_s9, 4294967168  ;;  %s22_s23 = sadd.s32 1, %s984_s23   ;;  %s1185_s18 = smov %s968_s19 }
 0x155   : > { %p19_p7 = scmp.ge.s32.totalorder %s22_s23, 4   ;;  %s1186_s19 = smov %s972_s20 }
 0x156   : > { %s1187_s20 = smov %s1099_s28  ;;  %s1188_s21 = smov %s980_s22 }
 0x157   : > { %s1189_s22 = smov %s1191_s14  ;;  %21 = sbr.rel (!%p19_p7) target bundleno = 7 (0x7), region = 106 }
 0x15c   :  { %528 = vsyncpa [#allocation3], 1 }
 0x15d   :  { %530 = vsyncpa [#allocation3 + $0x1], 1 }
 0x15e   :  { %531 = vsyncpa [#allocation6], 1 }
 0x15f   :  { %532 = vsyncpa [#allocation4], 1 }
 0x160   :  { %534 = vsyncpa [#allocation4 + $0x1], 1 }

</bundles_post_ra>
